<compile_context>
chip_gen: v5e
topology: v5e:2x2
jax: 0.10.0
libtpu: 0.0.40
codegen_flags: <defaults>
</compile_context>

<pallas_src>
from functools import partial

import jax
import jax.numpy as jnp
import numpy as np
from jax import lax
from jax.experimental import pallas as pl
from jax.experimental.pallas import tpu as pltpu

KERNEL_SIZE = 7  # the PyTorch module allows 3 or 7


def _round_up(v, m):
    return (v + m - 1) // m * m


# -----------------------------------------------------------------------------
# Kernel A: channel pooling.  pooled[n, 0] = mean_c x[n],  pooled[n, 1] = max_c x[n]
# -----------------------------------------------------------------------------
def _pool_kernel(x_ref, o_ref, *, C, CC, ragged, unroll):
    """grid = (batch, h_tile, c_chunk).
    x_ref: (CC, th, Wp) input chunk;  o_ref: (2, th, Wp) f32, resident across
    the c_chunk axis (output-block accumulator)."""
    c_idx = pl.program_id(2)
    n_chunks = pl.num_programs(2)

    @pl.when(c_idx == 0)
    def _init():
        o_ref[0] = jnp.zeros(o_ref.shape[1:], jnp.float32)
        o_ref[1] = jnp.full(o_ref.shape[1:], -jnp.inf, jnp.float32)

    if ragged:
        # cdiv(C, CC) grid: the last chunk holds fewer than CC valid channels.
        # Clamp the read index (never touch uninitialized VMEM) and weight the
        # duplicate reads by 0 for the sum; duplicates cannot change the max.
        n_valid = jnp.minimum(CC, C - c_idx * CC)

    def body(i, carry):
        s, m = carry
        if ragged:
            idx = jnp.minimum(i, n_valid - 1)
            w = (i < n_valid).astype(jnp.float32)          # scalar 0/1
            xi = x_ref[idx].astype(jnp.float32)            # (th, Wp)
            s = s + xi * w
            m = jnp.maximum(m, xi)
        else:
            xi = x_ref[i].astype(jnp.float32)
            s = s + xi
            m = jnp.maximum(m, xi)
        return s, m

    # Single (sum, max) carry: per-vreg ILP across the (th, Wp) plane keeps the
    # VALUs fed, and the kernel is HBM-bound regardless.
    s, m = lax.fori_loop(0, CC, body, (o_ref[0], o_ref[1]), unroll=unroll)
    o_ref[0] = s
    o_ref[1] = m

    @pl.when(c_idx == n_chunks - 1)
    def _finalize():
        o_ref[0] = o_ref[0] * jnp.float32(1.0 / C)         # sum -> mean


# -----------------------------------------------------------------------------
# Kernel B: KxK conv (zero padded) over the 2 pooled planes + sigmoid.
# -----------------------------------------------------------------------------
def _conv_sigmoid_kernel(w_ref, p_ref, o_ref, *, H, W, Hp, Wp, K, P,
                         mask_rows, mask_cols):
    """grid = (batch,).  p_ref: (2, Hp, Wp) f32 pooled [mean, max];
    o_ref: (Hp, Wp) attention map (cropped to (H, W) by the wrapper)."""
    avg = p_ref[0]
    mx = p_ref[1]

    # Hoist all 2*K*K SMEM weight reads out of the tap loops.
    wv = [[[w_ref[(p * K + kh) * K + kw] for kw in range(K)]
           for kh in range(K)] for p in range(2)]

    # Border masks are only traced when the zero-padding slack does not cover
    # the conv halo; otherwise the padded zeros of the pooled planes already
    # realize zero padding under the wrap-around rolls (the padded output
    # region is cropped by the wrapper anyway).
    if mask_rows:
        row = lax.broadcasted_iota(jnp.int32, (Hp, Wp), 0)
        row_ok = [jnp.logical_and(row + (kh - P) >= 0, row + (kh - P) < H)
                  for kh in range(K)]
    if mask_cols:
        col = lax.broadcasted_iota(jnp.int32, (Hp, Wp), 1)
        col_ok = [jnp.logical_and(col + (kw - P) >= 0, col + (kw - P) < W)
                  for kw in range(K)]

    # acc[h,w] = sum_{p,kh,kw} W[p,kh,kw] * plane_p[h+kh-P, w+kw-P]  (zero pad)
    acc = jnp.zeros((Hp, Wp), jnp.float32)
    for kh in range(K):
        dh = kh - P
        if dh == 0:
            a_r, m_r = avg, mx
        else:
            a_r = pltpu.roll(avg, shift=(-dh) % Hp, axis=0)
            m_r = pltpu.roll(mx, shift=(-dh) % Hp, axis=0)
        if mask_rows:
            a_r = jnp.where(row_ok[kh], a_r, 0.0)
            m_r = jnp.where(row_ok[kh], m_r, 0.0)
        for kw in range(K):
            dw = kw - P
            comb = wv[0][kh][kw] * a_r + wv[1][kh][kw] * m_r
            if dw != 0:
                comb = pltpu.roll(comb, shift=(-dw) % Wp, axis=1)
            if mask_cols:
                comb = jnp.where(col_ok[kw], comb, 0.0)
            acc = acc + comb

    o_ref[...] = jax.nn.sigmoid(acc).astype(o_ref.dtype)


# -----------------------------------------------------------------------------
# Wrapper
# -----------------------------------------------------------------------------
def spatial_attention(x, conv_weight, *, compute_dtype=None,
                      chunk_bytes=8 * 1024 * 1024):
    """x: (N, C, H, W); conv_weight: (1, 2, K, K).  Returns (N, 1, H, W).

    compute_dtype: optionally cast x (e.g. jnp.bfloat16) to halve HBM traffic
      on this memory-bound kernel; accumulation stays f32 inside the kernel.
    chunk_bytes: per-grid-step x byte budget (~8 MiB hides the ~0.35 us
      grid-step overhead behind the HBM DMA on all TPU generations).
    """
    N, C, H, W = x.shape
    K = conv_weight.shape[-1]
    P = K // 2
    if compute_dtype is not None:
        x = x.astype(compute_dtype)
    out_dtype = x.dtype
    itemsize = jnp.dtype(x.dtype).itemsize
    w_flat = conv_weight.reshape(-1).astype(jnp.float32)   # (2*K*K,): (in, kh, kw)

    # Lane-dense padded layout: W -> multiple of 128, H -> multiple of 8 (16 for
    # packed sub-32-bit dtypes).  Zero padding is exact for the pooled planes
    # and the padded output region is cropped.
    sub = 16 if itemsize < 4 else 8
    Hp = _round_up(H, sub)
    Wp = _round_up(W, 128)
    if (Hp, Wp) != (H, W):
        x_p = jnp.pad(x, ((0, 0), (0, 0), (0, Hp - H), (0, Wp - W)))
    else:
        x_p = x

    # --- H tile: a multiple of `sub` dividing Hp whose single-channel slab is
    # <= 2 MiB (keeps the double-buffered pooled output block small), split
    # when N == 1 so both TensorCores (v7x megacore) get work.
    slab_cap = min(chunk_bytes, 2 * 1024 * 1024)
    cands = [t for t in range(sub, Hp + 1, sub) if Hp % t == 0]
    fit = [t for t in cands if t * Wp * itemsize <= slab_cap] or cands[:1]
    th = fit[-1]
    if N == 1 and th == Hp and len(cands) > 1:
        th = cands[-2]
    n_h = Hp // th

    # --- Channel chunk: as many channels as fit the byte budget; cdiv grid,
    # ragged tail handled inside the kernel.
    cc = max(1, min(C, chunk_bytes // (th * Wp * itemsize)))
    n_c = pl.cdiv(C, cc)
    ragged = (C % cc) != 0

    pooled = pl.pallas_call(
        partial(_pool_kernel, C=C, CC=cc, ragged=ragged, unroll=min(8, cc)),
        out_shape=jax.ShapeDtypeStruct((N, 2, Hp, Wp), jnp.float32),
        grid=(N, n_h, n_c),
        in_specs=[
            pl.BlockSpec((None, cc, th, Wp), lambda n, h, c: (n, c, h, 0)),
        ],
        out_specs=pl.BlockSpec((None, 2, th, Wp), lambda n, h, c: (n, 0, h, 0)),
        compiler_params=pltpu.CompilerParams(
            dimension_semantics=("parallel", "parallel", "arbitrary"),
            vmem_limit_bytes=48 * 1024 * 1024),
        cost_estimate=pl.CostEstimate(
            flops=int(2 * N * C * Hp * Wp),
            transcendentals=0,
            bytes_accessed=int(N * C * Hp * Wp * itemsize
                               + N * 2 * Hp * Wp * 4)),
    )(x_p)

    # TODO(synk): spatially tile the conv kernel (with P-row halos) if Hp*Wp
    # ever grows large enough that two resident f32 planes stress VMEM.
    out_p = pl.pallas_call(
        partial(_conv_sigmoid_kernel, H=H, W=W, Hp=Hp, Wp=Wp, K=K, P=P,
                mask_rows=(Hp - H) < P, mask_cols=(Wp - W) < P),
        out_shape=jax.ShapeDtypeStruct((N, 1, Hp, Wp), out_dtype),
        grid=(N,),
        in_specs=[
            pl.BlockSpec(memory_space=pltpu.MemorySpace.SMEM),        # weights
            pl.BlockSpec((None, 2, Hp, Wp), lambda n: (n, 0, 0, 0)),  # pooled
        ],
        out_specs=pl.BlockSpec((None, None, Hp, Wp), lambda n: (n, 0, 0, 0)),
        compiler_params=pltpu.CompilerParams(
            dimension_semantics=("parallel",),
            vmem_limit_bytes=48 * 1024 * 1024),
        cost_estimate=pl.CostEstimate(
            flops=int(N * Hp * Wp * (4 * K * K + 1)),
            transcendentals=int(N * Hp * Wp),
            bytes_accessed=int(N * Hp * Wp * (2 * 4 + itemsize))),
    )(w_flat, pooled)

    return out_p[:, :, :H, :W]


# -----------------------------------------------------------------------------
# Reference + self-test
# -----------------------------------------------------------------------------
def _reference(x, conv_weight):
    xf = x.astype(jnp.float32)
    avg = jnp.mean(xf, axis=1, keepdims=True)
    mx = jnp.max(xf, axis=1, keepdims=True)
    cat = jnp.concatenate([avg, mx], axis=1)
    P = conv_weight.shape[-1] // 2
    y = lax.conv_general_dilated(
        cat, conv_weight.astype(jnp.float32), window_strides=(1, 1),
        padding=[(P, P), (P, P)],
        dimension_numbers=("NCHW", "OIHW", "NCHW"))
    return jax.nn.sigmoid(y).astype(x.dtype)


if __name__ == "__main__":
    key = jax.random.PRNGKey(0)

    cases = [
        # Base case (matches the module defaults, kernel_size=7, f32).
        dict(N=2, C=4, H=16, W=16, K=7, dtype=jnp.float32,
             chunk=8 * 1024 * 1024, tol=1e-5),
        # W multiple of 128 (zero lane slack -> column-mask path), N == 1
        # (exercises the H-tile parallel axis), non-divisor C with a tiny
        # chunk budget (ragged-tail path), kernel_size=3.
        dict(N=1, C=5, H=16, W=128, K=3, dtype=jnp.float32,
             chunk=2 * 16 * 128 * 4, tol=1e-5),
        # bf16 input (halved HBM bytes), H not a multiple of the sublane tile
        # (padding slack covers the halo -> mask-free conv path).
        dict(N=2, C=6, H=10, W=20, K=7, dtype=jnp.bfloat16,
             chunk=8 * 1024 * 1024, tol=1.5e-2),
    ]

    for i, c in enumerate(cases):
        kx, kw = jax.random.split(jax.random.fold_in(key, i))
        x = jax.random.normal(
            kx, (c["N"], c["C"], c["H"], c["W"]), dtype=jnp.float32
        ).astype(c["dtype"])
        conv_weight = 0.1 * jax.random.normal(
            kw, (1, 2, c["K"], c["K"]), dtype=jnp.float32)

        out = jax.block_until_ready(
            spatial_attention(x, conv_weight, chunk_bytes=c["chunk"]))
        ref = jax.block_until_ready(_reference(x, conv_weight))

        assert out.shape == (c["N"], 1, c["H"], c["W"]), out.shape
        np.testing.assert_allclose(np.asarray(out, np.float32),
                                   np.asarray(ref, np.float32),
                                   rtol=c["tol"], atol=c["tol"])

    print("KERNEL_OK")
</pallas_src>

<mosaic_0001>
module attributes {stable_mosaic.version = 11 : i64} {
  func.func @_pool_kernel(%arg0: i32, %arg1: i32, %arg2: i32, %arg3: memref<1x4x16x128xf32, #tpu.memory_space<vmem>>, %arg4: memref<1x2x16x128xf32, #tpu.memory_space<vmem>>) attributes {dimension_semantics = [#tpu.dimension_semantics<parallel>, #tpu.dimension_semantics<parallel>, #tpu.dimension_semantics<arbitrary>], iteration_bounds = array<i64: 2, 1, 1>, scalar_prefetch = 0 : i64, scratch_operands = 0 : i64, tpu.core_type = #tpu.core_type<tc>, window_params = [{transform_indices = @transform_0, window_bounds = array<i64: 1, 4, 16, 128>}, {transform_indices = @transform_1, window_bounds = array<i64: 1, 2, 16, 128>}]} {
    %c0_i32 = arith.constant 0 : i32
    %0 = arith.cmpi eq, %arg2, %c0_i32 : i32
    %1 = arith.extui %0 : i1 to i32
    %c0_i32_0 = arith.constant 0 : i32
    %2 = arith.cmpi ne, %1, %c0_i32_0 : i32
    scf.if %2 {
      %cst = arith.constant 0.000000e+00 : f32
      %36 = vector.broadcast %cst : f32 to vector<16x128xf32>
      %c0_30 = arith.constant 0 : index
      %c0_31 = arith.constant 0 : index
      %c0_32 = arith.constant 0 : index
      %c0_33 = arith.constant 0 : index
      %37 = vector.load %arg4[%c0_30, %c0_31, %c0_32, %c0_33] : memref<1x2x16x128xf32, #tpu.memory_space<vmem>>, vector<1x1x16x128xf32>
      %38 = vector.shape_cast %37 : vector<1x1x16x128xf32> to vector<16x128xf32>
      %39 = vector.shape_cast %36 : vector<16x128xf32> to vector<1x1x16x128xf32>
      tpu.vector_store %arg4[%c0_30, %c0_31, %c0_32, %c0_33], %39 {strides = array<i32>} : memref<1x2x16x128xf32, #tpu.memory_space<vmem>>, vector<1x1x16x128xf32>,
      %cst_34 = arith.constant 0xFF800000 : f32
      %40 = vector.broadcast %cst_34 : f32 to vector<16x128xf32>
      %c0_35 = arith.constant 0 : index
      %c1_36 = arith.constant 1 : index
      %c0_37 = arith.constant 0 : index
      %c0_38 = arith.constant 0 : index
      %41 = vector.load %arg4[%c0_35, %c1_36, %c0_37, %c0_38] : memref<1x2x16x128xf32, #tpu.memory_space<vmem>>, vector<1x1x16x128xf32>
      %42 = vector.shape_cast %41 : vector<1x1x16x128xf32> to vector<16x128xf32>
      %43 = vector.shape_cast %40 : vector<16x128xf32> to vector<1x1x16x128xf32>
      tpu.vector_store %arg4[%c0_35, %c1_36, %c0_37, %c0_38], %43 {strides = array<i32>} : memref<1x2x16x128xf32, #tpu.memory_space<vmem>>, vector<1x1x16x128xf32>,
    } else {
    }
    %c0 = arith.constant 0 : index
    %c0_1 = arith.constant 0 : index
    %c0_2 = arith.constant 0 : index
    %c0_3 = arith.constant 0 : index
    %3 = vector.load %arg4[%c0, %c0_1, %c0_2, %c0_3] : memref<1x2x16x128xf32, #tpu.memory_space<vmem>>, vector<1x1x16x128xf32>
    %4 = vector.shape_cast %3 : vector<1x1x16x128xf32> to vector<16x128xf32>
    %c0_4 = arith.constant 0 : index
    %c1 = arith.constant 1 : index
    %c0_5 = arith.constant 0 : index
    %c0_6 = arith.constant 0 : index
    %5 = vector.load %arg4[%c0_4, %c1, %c0_5, %c0_6] : memref<1x2x16x128xf32, #tpu.memory_space<vmem>>, vector<1x1x16x128xf32>
    %6 = vector.shape_cast %5 : vector<1x1x16x128xf32> to vector<16x128xf32>
    %c0_i32_7 = arith.constant 0 : i32
    %c0_8 = arith.constant 0 : index
    %7 = arith.index_cast %c0_i32_7 : i32 to index
    %c0_9 = arith.constant 0 : index
    %c0_10 = arith.constant 0 : index
    %8 = vector.load %arg3[%c0_8, %7, %c0_9, %c0_10] : memref<1x4x16x128xf32, #tpu.memory_space<vmem>>, vector<1x1x16x128xf32>
    %9 = vector.shape_cast %8 : vector<1x1x16x128xf32> to vector<16x128xf32>
    %10 = arith.addf %4, %9 : vector<16x128xf32>
    %11 = arith.maximumf %6, %9 : vector<16x128xf32>
    %c1_i32 = arith.constant 1 : i32
    %c0_11 = arith.constant 0 : index
    %12 = arith.index_cast %c1_i32 : i32 to index
    %c0_12 = arith.constant 0 : index
    %c0_13 = arith.constant 0 : index
    %13 = vector.load %arg3[%c0_11, %12, %c0_12, %c0_13] : memref<1x4x16x128xf32, #tpu.memory_space<vmem>>, vector<1x1x16x128xf32>
    %14 = vector.shape_cast %13 : vector<1x1x16x128xf32> to vector<16x128xf32>
    %15 = arith.addf %10, %14 : vector<16x128xf32>
    %16 = arith.maximumf %11, %14 : vector<16x128xf32>
    %c2_i32 = arith.constant 2 : i32
    %c0_14 = arith.constant 0 : index
    %17 = arith.index_cast %c2_i32 : i32 to index
    %c0_15 = arith.constant 0 : index
    %c0_16 = arith.constant 0 : index
    %18 = vector.load %arg3[%c0_14, %17, %c0_15, %c0_16] : memref<1x4x16x128xf32, #tpu.memory_space<vmem>>, vector<1x1x16x128xf32>
    %19 = vector.shape_cast %18 : vector<1x1x16x128xf32> to vector<16x128xf32>
    %20 = arith.addf %15, %19 : vector<16x128xf32>
    %21 = arith.maximumf %16, %19 : vector<16x128xf32>
    %c3_i32 = arith.constant 3 : i32
    %c0_17 = arith.constant 0 : index
    %22 = arith.index_cast %c3_i32 : i32 to index
    %c0_18 = arith.constant 0 : index
    %c0_19 = arith.constant 0 : index
    %23 = vector.load %arg3[%c0_17, %22, %c0_18, %c0_19] : memref<1x4x16x128xf32, #tpu.memory_space<vmem>>, vector<1x1x16x128xf32>
    %24 = vector.shape_cast %23 : vector<1x1x16x128xf32> to vector<16x128xf32>
    %25 = arith.addf %20, %24 : vector<16x128xf32>
    %26 = arith.maximumf %21, %24 : vector<16x128xf32>
    %c4_i32 = arith.constant 4 : i32
    %c0_20 = arith.constant 0 : index
    %c0_21 = arith.constant 0 : index
    %c0_22 = arith.constant 0 : index
    %c0_23 = arith.constant 0 : index
    %27 = vector.load %arg4[%c0_20, %c0_21, %c0_22, %c0_23] : memref<1x2x16x128xf32, #tpu.memory_space<vmem>>, vector<1x1x16x128xf32>
    %28 = vector.shape_cast %27 : vector<1x1x16x128xf32> to vector<16x128xf32>
    %29 = vector.shape_cast %25 : vector<16x128xf32> to vector<1x1x16x128xf32>
    tpu.vector_store %arg4[%c0_20, %c0_21, %c0_22, %c0_23], %29 {strides = array<i32>} : memref<1x2x16x128xf32, #tpu.memory_space<vmem>>, vector<1x1x16x128xf32>,
    %c0_24 = arith.constant 0 : index
    %c1_25 = arith.constant 1 : index
    %c0_26 = arith.constant 0 : index
    %c0_27 = arith.constant 0 : index
    %30 = vector.load %arg4[%c0_24, %c1_25, %c0_26, %c0_27] : memref<1x2x16x128xf32, #tpu.memory_space<vmem>>, vector<1x1x16x128xf32>
    %31 = vector.shape_cast %30 : vector<1x1x16x128xf32> to vector<16x128xf32>
    %32 = vector.shape_cast %26 : vector<16x128xf32> to vector<1x1x16x128xf32>
    tpu.vector_store %arg4[%c0_24, %c1_25, %c0_26, %c0_27], %32 {strides = array<i32>} : memref<1x2x16x128xf32, #tpu.memory_space<vmem>>, vector<1x1x16x128xf32>,
    %c0_i32_28 = arith.constant 0 : i32
    %33 = arith.cmpi eq, %arg2, %c0_i32_28 : i32
    %34 = arith.extui %33 : i1 to i32
    %c0_i32_29 = arith.constant 0 : i32
    %35 = arith.cmpi ne, %34, %c0_i32_29 : i32
    scf.if %35 {
      %c0_30 = arith.constant 0 : index
      %c0_31 = arith.constant 0 : index
      %c0_32 = arith.constant 0 : index
      %c0_33 = arith.constant 0 : index
      %36 = vector.load %arg4[%c0_30, %c0_31, %c0_32, %c0_33] : memref<1x2x16x128xf32, #tpu.memory_space<vmem>>, vector<1x1x16x128xf32>
      %37 = vector.shape_cast %36 : vector<1x1x16x128xf32> to vector<16x128xf32>
      %cst = arith.constant 2.500000e-01 : f32
      %38 = vector.broadcast %cst : f32 to vector<16x128xf32>
      %39 = arith.mulf %37, %38 : vector<16x128xf32>
      %c0_34 = arith.constant 0 : index
      %c0_35 = arith.constant 0 : index
      %c0_36 = arith.constant 0 : index
      %c0_37 = arith.constant 0 : index
      %40 = vector.load %arg4[%c0_34, %c0_35, %c0_36, %c0_37] : memref<1x2x16x128xf32, #tpu.memory_space<vmem>>, vector<1x1x16x128xf32>
      %41 = vector.shape_cast %40 : vector<1x1x16x128xf32> to vector<16x128xf32>
      %42 = vector.shape_cast %39 : vector<16x128xf32> to vector<1x1x16x128xf32>
      tpu.vector_store %arg4[%c0_34, %c0_35, %c0_36, %c0_37], %42 {strides = array<i32>} : memref<1x2x16x128xf32, #tpu.memory_space<vmem>>, vector<1x1x16x128xf32>,
    } else {
    }
    return
  }
  func.func @transform_0(%arg0: i32, %arg1: i32, %arg2: i32) -> (i32, i32, i32, i32) {
    %c0_i32 = arith.constant 0 : i32
    %c0_i32_0 = arith.constant 0 : i32
    return %arg0, %arg2, %arg1, %c0_i32 : i32, i32, i32, i32
  }
  func.func @transform_1(%arg0: i32, %arg1: i32, %arg2: i32) -> (i32, i32, i32, i32) {
    %c0_i32 = arith.constant 0 : i32
    %c0_i32_0 = arith.constant 0 : i32
    %c0_i32_1 = arith.constant 0 : i32
    return %arg0, %c0_i32, %arg1, %c0_i32_0 : i32, i32, i32, i32
  }
}

</mosaic_0001>

<bundles_post_ra>
// kernel: tpu_custom_call.1
= control target key start
LH: loop header
LB: loop body
LE: loop exit
PB: predicated region body
PF: predicated region fallthrough
CT: control target
= control target key end

     0   :  { %6 = vsyncpa [#allocation3], 0  ;;  %s680_s0 = inlined_call_operand.hbm [shape: f32[2,4,16,128], index: 0, kind: input, shape index: {}]   ;;  %s681_s1 = inlined_call_operand.hbm [shape: f32[2,2,16,128], index: 1, kind: output, shape index: {}]  }
   0x1   :  { %8 = vsyncpa [#allocation3 + $0x1], 0 }
   0x2   :  { %9 = vsyncpa [#allocation4], 0 }
   0x3   :  { %11 = vsyncpa [#allocation4 + $0x1], 0  ;;  %s559_s6 = smov 0   ;;  %s561_s7 = smov 0  }
   0x4   :  { %s563_s8 = smov 0   ;;  %s565_s9 = smov 0  }
   0x5   :  { %s567_s10 = smov 0   ;;  %s569_s11 = smov 0  }
   0x6 LB: > { %s334_s12 = sadd.s32 4294967295, %s543_s11   ;;  %s335_s13 = sadd.s32 4294967294, %s543_s11   ;;  %s543_s11 = sphi %s569_s11, %s17_s11   ;;  %s539_s10 = sphi %s567_s10, %s690_s10   ;;  %s535_s9 = sphi %s565_s9, %s689_s9   ;;  %s531_s8 = sphi %s563_s8, %s688_s8   ;;  %s527_s7 = sphi %s561_s7, %s687_s7   ;;  %s523_s6 = sphi %s559_s6, %s686_s6  }
   0x7   : > { %s36_s14 = sadd.s32 1, %s539_s10  ;;  %s47_s15 = sadd.s32 1, %s531_s8 }
   0x8   : > { %p38_p0 = scmp.ge.s32.totalorder %s36_s14, 2  ;;  %p54_p1 = scmp.ne.s32.totalorder %s531_s8, %s527_s7 }
   0x9   : > { %p55_p2 = scmp.eq.s32.totalorder %s543_s11, 0  ;;  %p60_p3 = scmp.ne.s32.totalorder %s527_s7, %s523_s6 }
   0xa   : > { %s692_s14 = smov (%p38_p0, %s36_s14), 0  ;;  %p61_p5 = scmp.eq.s32.totalorder %s334_s12, 0 }
   0xb   : > { %p600_p4 = por %p55_p2, %p54_p1  ;;  %s40_s17 = ssub.s32 %s539_s10, %s692_s14 }
   0xc   : > { %p86_p6 = scmp.eq.s32.totalorder %s334_s12, 1  ;;  %p45_p7 = scmp.eq.s32.totalorder %s40_s17, 0 }
   0xd   : > { %p606_p8 = por %p61_p5, %p60_p3  ;;  %p92_p10 = scmp.eq.s32.totalorder %s335_s13, 1 }
   0xe   : > { %p610_p9 = por %p86_p6, %p54_p1  ;;  %p337_p12 = scmp.ge.s32.totalorder %s543_s11, 2 }
   0xf   : > { %s615_s20 = scalar_select %p45_p7, %s531_s8, %s47_s15  }
  0x10   : > { %p617_p11 = por %p92_p10, %p60_p3  ;;  %p375_p13 = scmp.lt.s32.totalorder %s543_s11, 2 }
  0x11   : > { %s112_s22 = sand.u32 1, %s531_s8   ;;  %s361_s24 = sshll.u32 %s539_s10, 6 }
  0x12   : > { %s338_s23 = sshll.u32 %s112_s22, 6  ;;  %s126_s27 = scalar_lea.hbm %s680_s0, %s361_s24 }
  0x13   : > { %s116_s28 = scalar_lea.vmem [#allocation2], %s338_s23  ;;  %s127_s30 = sshll.u32 %s126_s27, 4  ;;  %s128_s30 = int_to_ptr.hbm [resolvable:$true] %s127_s30 }
  0x14   : > { %s129_s29 = sshll.u32 %s116_s28, 4  ;;  %p368_p0 = pnand %p375_p13, %p600_p4  ;;  %s130_s29 = int_to_ptr.vmem [resolvable:$true] %s129_s29 }
  0x15   : > { %p341_p1 = scmp.ge.s32.totalorder %s543_s11, 1  ;;  %s113_s2 = scalar_lea.sflag [#allocation3], %s112_s22 }
  0x16   : > { %s545_s3 = smov 128   ;;  %s546_s4 = smov 8  }
  0x17   : > { %370 = dma.hbm_to_vmem [thread:$0]  (!%p368_p0), %s128_s30, 1024, %s130_s29, %s113_s2, %s545_s3, %s545_s3, %s546_s4  }
  0x18   : > { %p137_p2 = scmp.lt.s32.totalorder %s543_s11, 3 }
  0x1a   : > { %p138_p3 = pnand %p341_p1, %p137_p2 }
  0x1b   : > { %s633_s5 = sand.u32 (!%p138_p3), 1, %s527_s7  }
  0x1c   : > { %141 = sbr.rel (%p138_p3) target bundleno = 50 (0x32), region = 24  ;;  %s342_s12 = sshll.u32 (!%p138_p3), %s633_s5, 6 }
  0x1d   : > { %s144_s13 = scalar_lea.sflag (!%p138_p3), [#allocation3], %s633_s5  ;;  %s147_s15 = scalar_lea.vmem (!%p138_p3), [#allocation2], %s342_s12 }
  0x21   : > { %514 = dma.done.wait (%p606_p8), %s144_s13, 1024  }
  0x22   : > { %516 = vsyncadd (%p606_p8), %s144_s13, 4294966272  ;;  %s343_s16 = sshll.u32 %s633_s5, 5  ;;  %v184_v0 = vld [vmem:[%s147_s15] sm:$0xff]  ;;  %v348_v1 = vld [vmem:[%s147_s15 + $0x10] sm:$0xff]  ;;  %s362_s17 = sshll.u32 %s535_s9, 5 }
  0x23   : > { %v185_v2 = vld [vmem:[%s147_s15 + $0x8] sm:$0xff]  ;;  %v349_v3 = vld [vmem:[%s147_s15 + $0x18] sm:$0xff]  ;;  %v350_v4 = vld [vmem:[%s147_s15 + $0x20] sm:$0xff]  ;;  %v193_v5 = vadd.f32 %v348_v1, %v184_v0  ;;  %v195_v7 = vmax.f32 %v184_v0, %v348_v1  ;;  %s238_s24 = scalar_lea.hbm %s681_s1, %s362_s17  ;;  %s166_s9 = scalar_lea.vmem [#allocation5], %s343_s16 }
  0x24   : > { %v351_v6 = vld [vmem:[%s147_s15 + $0x28] sm:$0xff]  ;;  %v352_v8 = vld [vmem:[%s147_s15 + $0x30] sm:$0xff]  ;;  %v194_v9 = vadd.f32 %v349_v3, %v185_v2  ;;  %v196_v10 = vmax.f32 %v185_v2, %v349_v3  ;;  %v353_v12 = vld [vmem:[%s147_s15 + $0x38] sm:$0xff]  ;;  %s239_s18 = sshll.u32 %s166_s9, 4  ;;  %s241_s25 = sshll.u32 %s238_s24, 4  ;;  %s240_s18 = int_to_ptr.vmem [resolvable:$true] %s239_s18  ;;  %s242_s25 = int_to_ptr.hbm [resolvable:$true] %s241_s25 }
  0x25   : > { %v200_v11 = vadd.f32 %v350_v4, %v193_v5  ;;  %v202_v13 = vmax.f32 %v195_v7, %v350_v4  ;;  %s225_s26 = scalar_lea.sflag [#allocation4], %s633_s5  ;;  %s475_s27 = sshra.s32 %s242_s25, 4  ;;  %s476_s27 = int_to_ptr.hbm [resolvable:$true] %s475_s27 }
  0x26   : > { %v201_v14 = vadd.f32 %v351_v6, %v194_v9  ;;  %v203_v15 = vmax.f32 %v196_v10, %v351_v6  ;;  %s477_s28 = scalar_lea.hbm %s476_s27, 32  ;;  %s481_s2 = scalar_lea.hbm %s681_s1, 64 }
  0x27   : > { %v207_v16 = vadd.f32 %v352_v8, %v200_v11  ;;  %v209_v17 = vmax.f32 %v202_v13, %v352_v8  ;;  %p478_p4 = scmp.ne.s32.totalorder %s476_s27, %s477_s28  ;;  %p482_p7 = scmp.lt.s32.totalorder %s476_s27, %s681_s1 }
  0x28   : > { %v208_v18 = vadd.f32 %v353_v12, %v201_v14  ;;  %v210_v19 = vmax.f32 %v203_v15, %v353_v12  ;;  %p483_p8 = scmp.lt.s32.totalorder %s481_s2, %s477_s28 }
  0x29   : > { %354 = vst [vmem:[%s166_s9 + $0x10] sm:$0xff] %v209_v17  ;;  %v220_v20 = vmul.f32 0.25, %v207_v16  ;;  %p479_p5 = pnand %p478_p4, %p610_p9 }
  0x2a   : > { %355 = vst [vmem:[%s166_s9 + $0x18] sm:$0xff] %v210_v19  ;;  %v221_v21 = vmul.f32 0.25, %v208_v18  ;;  %p484_p10 = por %p483_p8, %p482_p7 }
  0x2b   : > { %222 = vst [vmem:[%s166_s9] sm:$0xff] %v220_v20  ;;  %p480_p6 = pneg %p479_p5 }
  0x2c   : > { %223 = vst [vmem:[%s166_s9 + $0x8] sm:$0xff] %v221_v21 }
  0x2d   : > { %p485_p13 = pnand %p484_p10, %p480_p6 }
  0x2f   : > { %488 = shalt.err (!%p485_p13)
}
  0x30   : > { %s547_s5 = smov 128   ;;  %s548_s12 = smov 8  }
  0x31   : > { %365 = dma.vmem_to_hbm [thread:$0]  (%p610_p9), %s240_s18, 512, %s242_s25, %s225_s26, %s547_s5, %s547_s5, %s548_s12  }
  0x32 PF: > { %s256_s13 = sand.u32 1, %s523_s6   ;;  %p372_p0 = pnand %p337_p12, %p617_p11 }
  0x33   : > { %s257_s15 = scalar_lea.sflag [#allocation4], %s256_s13 }
  0x34   : > { %p373_p1 = pneg %p372_p0 }
  0x36   : > { %518 = dma.done.wait (%p373_p1), %s257_s15, 512  }
  0x37   : > { %520 = vsyncadd (%p373_p1), %s257_s15, 4294966784  ;;  %s17_s11 = sadd.s32 1, %s543_s11   ;;  %s686_s6 = smov %s527_s7 }
  0x38   : > { %p14_p2 = scmp.ge.s32.totalorder %s17_s11, 4   ;;  %s687_s7 = smov %s531_s8 }
  0x39   : > { %s688_s8 = smov %s615_s20  ;;  %s689_s9 = smov %s539_s10 }
  0x3a   : > { %s690_s10 = smov %s692_s14  ;;  %16 = sbr.rel (!%p14_p2) target bundleno = 6 (0x6), region = 82 }
  0x3f   :  { %263 = vsyncpa [#allocation3], 1 }
  0x40   :  { %265 = vsyncpa [#allocation3 + $0x1], 1 }
  0x41   :  { %266 = vsyncpa [#allocation4], 1 }
  0x42   :  { %268 = vsyncpa [#allocation4 + $0x1], 1 }

</bundles_post_ra>
